<compile_context>
chip_gen: v5e
topology: v5e:2x2
jax: 0.10.0
libtpu: 0.0.40
codegen_flags: <defaults>
</compile_context>

<pallas_src>
import functools

import jax
import jax.numpy as jnp
from jax.experimental import pallas as pl
from jax.experimental.pallas import tpu as pltpu


def _round_up(x: int, m: int) -> int:
    return ((x + m - 1) // m) * m


def _linear_branch_kernel(x_ref, w1_ref, b1_ref, w2_ref, b2_ref, o_ref):
    # In-kernel bf16 cast of the activations (avoids a separate HBM convert).
    x = x_ref[...].astype(w1_ref.dtype)
    # hidden = relu(x @ W1 + b1): bf16 operands, f32 MXU accumulation.
    h = jnp.dot(x, w1_ref[...], preferred_element_type=jnp.float32)
    h = jnp.maximum(h + b1_ref[...], 0.0)            # bias + ReLU in f32 (VPU)
    # out = hidden @ W2 + b2: second MXU pass, unpadded output columns.
    o = jnp.dot(h.astype(w2_ref.dtype), w2_ref[...],
                preferred_element_type=jnp.float32)
    o_ref[...] = (o + b2_ref[...]).astype(o_ref.dtype)


def prepare_params(w1, b1, w2, b2, *, compute_dtype=jnp.bfloat16):
    """One-time parameter prep (do NOT call per forward).

    torch layout in:  w1 [hid, in], b1 [hid], w2 [out, hid], b2 [out]
    kernel layout out: W1 [in, hid_pad] bf16, b1 [1, hid_pad] f32,
                       W2 [hid_pad, out] bf16, b2 [1, out] f32.
    Only the hidden dim is padded (to 128); padded hidden units see
    relu(0 + 0) = 0 and the matching W2 rows are zero, so padding is inert.
    The output feature dim is left unpadded.  Returns arrays only (jit-safe).
    """
    hid, in_f = w1.shape
    out_f = w2.shape[0]
    hid_pad = _round_up(hid, 128)

    w1_t = jnp.zeros((in_f, hid_pad), compute_dtype)
    w1_t = w1_t.at[:, :hid].set(w1.T.astype(compute_dtype))
    b1_r = jnp.zeros((1, hid_pad), jnp.float32)
    b1_r = b1_r.at[:, :hid].set(b1.astype(jnp.float32))

    w2_t = jnp.zeros((hid_pad, out_f), compute_dtype)
    w2_t = w2_t.at[:hid, :].set(w2.T.astype(compute_dtype))
    b2_r = b2.astype(jnp.float32).reshape(1, out_f)

    return (w1_t, b1_r, w2_t, b2_r)


@functools.partial(jax.jit, static_argnames=("batch_tile",))
def linear_branch(x, params, *, batch_tile: int = 512):
    """x: [B, in_features] -> [B, out_features] (forward of LinearBranch)."""
    w1_t, b1_r, w2_t, b2_r = params
    B, in_f = x.shape
    hid_pad = w1_t.shape[1]
    out_f = w2_t.shape[1]

    # Batch-tile selection (static, from shapes only):
    #  * tiny batches -> single block
    #  * mid-size batches -> split into >=2 grid steps (both v7x TCs get work)
    #  * large batches -> fixed 512-row tiles (near HBM roofline per sweeps)
    if B <= 16:
        tb = B
    elif B <= 2 * batch_tile:
        tb = _round_up(-(-B // 2), 8)
    else:
        tb = batch_tile
    grid = (pl.cdiv(B, tb),)

    # Explicit VMEM budget: double-buffered tiles + resident weights + headroom,
    # clamped to v7x's 64 MiB physical VMEM (v5e/v6e have 128 MiB).
    est = 2 * (w1_t.size * w1_t.dtype.itemsize
               + w2_t.size * w2_t.dtype.itemsize
               + b1_r.size * 4 + b2_r.size * 4
               + tb * in_f * x.dtype.itemsize
               + tb * out_f * x.dtype.itemsize) + (4 << 20)
    vmem_limit = int(min(max(est, 32 << 20), 64 << 20))

    return pl.pallas_call(
        _linear_branch_kernel,
        out_shape=jax.ShapeDtypeStruct((B, out_f), x.dtype),
        grid_spec=pl.GridSpec(
            grid=grid,
            in_specs=[
                pl.BlockSpec((tb, in_f), lambda i: (i, 0)),         # x: batch-tiled (f32)
                pl.BlockSpec((in_f, hid_pad), lambda i: (0, 0)),    # W1: resident
                pl.BlockSpec((1, hid_pad), lambda i: (0, 0)),       # b1: resident
                pl.BlockSpec((hid_pad, out_f), lambda i: (0, 0)),   # W2: resident
                pl.BlockSpec((1, out_f), lambda i: (0, 0)),         # b2: resident
            ],
            out_specs=pl.BlockSpec((tb, out_f), lambda i: (i, 0)),  # unpadded output
        ),
        compiler_params=pltpu.CompilerParams(
            dimension_semantics=("parallel",),   # shard batch tiles across TCs on v7x
            vmem_limit_bytes=vmem_limit,
        ),
    )(x, w1_t, b1_r, w2_t, b2_r)


if __name__ == "__main__":
    # Small shapes consistent with the module: batch=8, in=32, hidden=256, out=16.
    # (At this size the kernel is pure launch overhead; the tiling above only
    # pays off at realistic batch sizes.)
    B, IN_F, HID, OUT_F = 8, 32, 256, 16

    key = jax.random.PRNGKey(0)
    kx, kw1, kb1, kw2, kb2 = jax.random.split(key, 5)

    x = jax.random.normal(kx, (B, IN_F), dtype=jnp.float32)
    # Torch nn.Linear layout: weight [out, in], bias [out].
    w1 = jax.random.normal(kw1, (HID, IN_F), dtype=jnp.float32) * 0.05
    b1 = jax.random.normal(kb1, (HID,), dtype=jnp.float32) * 0.05
    w2 = jax.random.normal(kw2, (OUT_F, HID), dtype=jnp.float32) * 0.05
    b2 = jax.random.normal(kb2, (OUT_F,), dtype=jnp.float32) * 0.05

    # One-time parameter prep (transpose + hidden-pad + bf16 cast), then run.
    params = prepare_params(w1, b1, w2, b2)
    out = linear_branch(x, params)
    jax.block_until_ready(out)

    # Reference in plain JAX f32 (same math as the PyTorch forward).
    ref = jnp.maximum(x @ w1.T + b1, 0.0) @ w2.T + b2

    assert out.shape == (B, OUT_F), out.shape
    # bf16 MXU operands -> loosen tolerance vs. the f32 reference.
    err = float(jnp.max(jnp.abs(out - ref)))
    assert jnp.allclose(out, ref, atol=3e-2, rtol=3e-2), err

    print("KERNEL_OK")
</pallas_src>

<mosaic_0001>
module attributes {stable_mosaic.version = 11 : i64} {
  func.func @_linear_branch_kernel(%arg0: i32, %arg1: memref<8x32xf32, #tpu.memory_space<vmem>>, %arg2: memref<32x256xbf16, #tpu.memory_space<vmem>>, %arg3: memref<1x256xf32, #tpu.memory_space<vmem>>, %arg4: memref<256x16xbf16, #tpu.memory_space<vmem>>, %arg5: memref<1x16xf32, #tpu.memory_space<vmem>>, %arg6: memref<8x16xf32, #tpu.memory_space<vmem>>) attributes {dimension_semantics = [#tpu.dimension_semantics<parallel>], iteration_bounds = array<i64: 1>, scalar_prefetch = 0 : i64, scratch_operands = 0 : i64, tpu.core_type = #tpu.core_type<tc>, window_params = [{transform_indices = @transform_0, window_bounds = array<i64: 8, 32>}, {pipeline_mode = #tpu.pipeline_mode<synchronous>, transform_indices = @transform_1, window_bounds = array<i64: 32, 256>}, {pipeline_mode = #tpu.pipeline_mode<synchronous>, transform_indices = @transform_2, window_bounds = array<i64: 1, 256>}, {pipeline_mode = #tpu.pipeline_mode<synchronous>, transform_indices = @transform_3, window_bounds = array<i64: 256, 16>}, {pipeline_mode = #tpu.pipeline_mode<synchronous>, transform_indices = @transform_4, window_bounds = array<i64: 1, 16>}, {transform_indices = @transform_5, window_bounds = array<i64: 8, 16>}]} {
    %c0 = arith.constant 0 : index
    %c0_0 = arith.constant 0 : index
    %0 = vector.load %arg1[%c0, %c0_0] : memref<8x32xf32, #tpu.memory_space<vmem>>, vector<8x32xf32>
    %1 = arith.truncf %0 : vector<8x32xf32> to vector<8x32xbf16>
    %c0_1 = arith.constant 0 : index
    %c0_2 = arith.constant 0 : index
    %2 = vector.load %arg2[%c0_1, %c0_2] : memref<32x256xbf16, #tpu.memory_space<vmem>>, vector<32x256xbf16>
    %cst = arith.constant dense<0.000000e+00> : vector<8x256xf32>
    %3 = tpu.matmul %1, %2, %cst {dimension_numbers = #tpu.dot_dimension_numbers<[1], [0], [0], [1], [0, 0, 1, 1], [], []>} : vector<8x32xbf16>, vector<32x256xbf16>, vector<8x256xf32> -> vector<8x256xf32>
    %c0_3 = arith.constant 0 : index
    %c0_4 = arith.constant 0 : index
    %4 = vector.load %arg3[%c0_3, %c0_4] : memref<1x256xf32, #tpu.memory_space<vmem>>, vector<1x256xf32>
    %5 = vector.broadcast %4 : vector<1x256xf32> to vector<8x256xf32>
    %6 = arith.addf %3, %5 : vector<8x256xf32>
    %cst_5 = arith.constant 0.000000e+00 : f32
    %7 = vector.broadcast %cst_5 : f32 to vector<8x256xf32>
    %8 = arith.maximumf %6, %7 : vector<8x256xf32>
    %9 = arith.truncf %8 : vector<8x256xf32> to vector<8x256xbf16>
    %c0_6 = arith.constant 0 : index
    %c0_7 = arith.constant 0 : index
    %10 = vector.load %arg4[%c0_6, %c0_7] : memref<256x16xbf16, #tpu.memory_space<vmem>>, vector<256x16xbf16>
    %cst_8 = arith.constant dense<0.000000e+00> : vector<8x16xf32>
    %11 = tpu.matmul %9, %10, %cst_8 {dimension_numbers = #tpu.dot_dimension_numbers<[1], [0], [0], [1], [0, 0, 1, 1], [], []>} : vector<8x256xbf16>, vector<256x16xbf16>, vector<8x16xf32> -> vector<8x16xf32>
    %c0_9 = arith.constant 0 : index
    %c0_10 = arith.constant 0 : index
    %12 = vector.load %arg5[%c0_9, %c0_10] : memref<1x16xf32, #tpu.memory_space<vmem>>, vector<1x16xf32>
    %13 = vector.broadcast %12 : vector<1x16xf32> to vector<8x16xf32>
    %14 = arith.addf %11, %13 : vector<8x16xf32>
    %c0_11 = arith.constant 0 : index
    %c0_12 = arith.constant 0 : index
    %15 = vector.load %arg6[%c0_11, %c0_12] : memref<8x16xf32, #tpu.memory_space<vmem>>, vector<8x16xf32>
    tpu.vector_store %arg6[%c0_11, %c0_12], %14 {strides = array<i32>} : memref<8x16xf32, #tpu.memory_space<vmem>>, vector<8x16xf32>,
    return
  }
  func.func @transform_0(%arg0: i32) -> (i32, i32) {
    %c0_i32 = arith.constant 0 : i32
    %c0_i32_0 = arith.constant 0 : i32
    return %arg0, %c0_i32 : i32, i32
  }
  func.func @transform_1(%arg0: i32) -> (i32, i32) {
    %c0_i32 = arith.constant 0 : i32
    %c0_i32_0 = arith.constant 0 : i32
    %c0_i32_1 = arith.constant 0 : i32
    return %c0_i32, %c0_i32_0 : i32, i32
  }
  func.func @transform_2(%arg0: i32) -> (i32, i32) {
    %c0_i32 = arith.constant 0 : i32
    %c0_i32_0 = arith.constant 0 : i32
    %c0_i32_1 = arith.constant 0 : i32
    return %c0_i32, %c0_i32_0 : i32, i32
  }
  func.func @transform_3(%arg0: i32) -> (i32, i32) {
    %c0_i32 = arith.constant 0 : i32
    %c0_i32_0 = arith.constant 0 : i32
    %c0_i32_1 = arith.constant 0 : i32
    return %c0_i32, %c0_i32_0 : i32, i32
  }
  func.func @transform_4(%arg0: i32) -> (i32, i32) {
    %c0_i32 = arith.constant 0 : i32
    %c0_i32_0 = arith.constant 0 : i32
    %c0_i32_1 = arith.constant 0 : i32
    return %c0_i32, %c0_i32_0 : i32, i32
  }
  func.func @transform_5(%arg0: i32) -> (i32, i32) {
    %c0_i32 = arith.constant 0 : i32
    %c0_i32_0 = arith.constant 0 : i32
    return %arg0, %c0_i32 : i32, i32
  }
}

</mosaic_0001>

<bundles_post_ra>
// kernel: linear_branch.1
= control target key start
LH: loop header
LB: loop body
LE: loop exit
PB: predicated region body
PF: predicated region fallthrough
CT: control target
= control target key end

     0   :  { %vm54_vm0 = vcmask 261120   ;;  %s509_s0 = inlined_call_operand.vmem [shape: f32[8,32], index: 0, kind: input, shape index: {}]   ;;  %s510_s1 = inlined_call_operand.vmem [shape: bf16[32,256], index: 1, kind: input, shape index: {}]   ;;  %s511_s2 = inlined_call_operand.vmem [shape: f32[1,256], index: 2, kind: input, shape index: {}]   ;;  %s512_s3 = inlined_call_operand.vmem [shape: bf16[256,16], index: 3, kind: input, shape index: {}]   ;;  %s513_s4 = inlined_call_operand.vmem [shape: f32[1,16], index: 4, kind: input, shape index: {}]   ;;  %s514_s5 = inlined_call_operand.hbm [shape: f32[8,16], index: 5, kind: output, shape index: {}]  }
   0x1   :  { %v274_v0 = vld [vmem:[%s510_s1 + $0x10] sm:$0xf]  ;;  %v349_v1 = vld [vmem:[%s510_s1 + $0x14] sm:$0xf0]  ;;  %v348_v2 = vld [vmem:[%s510_s1 + $0x14] sm:$0xf] }
   0x2   :  { %v275_v3 = vor.u32 %v349_v1, %v274_v0  ;;  %v276_v4 = vld [vmem:[%s510_s1 + $0x18] sm:$0xf0]  ;;  %v266_v5 = vld [vmem:[%s510_s1] sm:$0xf]  ;;  %v347_v6 = vld [vmem:[%s510_s1 + $0x4] sm:$0xf0] }
   0x3   :  { %v279_v7 = vor.u32 %v348_v2, %v276_v4  ;;  %v346_v8 = vld [vmem:[%s510_s1 + $0x4] sm:$0xf]  ;;  %v268_v9 = vld [vmem:[%s510_s1 + $0x8] sm:$0xf0]  ;;  %v267_v10 = vor.u32 %v347_v6, %v266_v5  ;;  %v357_v12 = vld [vmem:[%s512_s3 + $0x38] sm:$0xff] }
   0x4   :  { %64 = vmatpush.bf16.msra.mxu0 %v275_v3  ;;  %v22_v11 = vld [vmem:[%s509_s0] sm:$0xff]  ;;  %v365_v13 = vld [vmem:[%s512_s3 + $0x78] sm:$0xff]  ;;  %v271_v14 = vor.u32 %v346_v8, %v268_v9  ;;  %220 = vmatpush.bf16.msra.mxu2 %v357_v12  ;;  %v356_v15 = vld [vmem:[%s512_s3 + $0x30] sm:$0xff] }
   0x5   :  { %77 = vmatpush.bf16.msra.mxu1 %v279_v7  ;;  %233 = vmatpush.bf16.msra.mxu3 %v365_v13  ;;  %v364_v16 = vld [vmem:[%s512_s3 + $0x70] sm:$0xff]  ;;  %v23_v17 = vpack.c.bf16 %v22_v11, %v22_v11 }
   0x8   :  { %65 = vmatpush.bf16.msra.mxu0 %v267_v10 }
   0x9   :  { %10 = vsyncpa [#allocation3], 0  ;;  %78 = vmatpush.bf16.msra.mxu1 %v271_v14  ;;  %221 = vmatpush.bf16.msra.mxu2 %v356_v15  ;;  %v355_v18 = vld [vmem:[%s512_s3 + $0x28] sm:$0xff]  ;;  %v354_v20 = vld [vmem:[%s512_s3 + $0x20] sm:$0xff]  ;;  %s255_s20 = sshll.u32 %s514_s5, 4  ;;  %vm246_vm1 = vcmask 130048   ;;  %s256_s20 = int_to_ptr.hbm [resolvable:$true] %s255_s20 }
   0xa   :  { %234 = vmatpush.bf16.msra.mxu3 %v364_v16  ;;  %v363_v19 = vld [vmem:[%s512_s3 + $0x68] sm:$0xff]  ;;  %v362_v21 = vld [vmem:[%s512_s3 + $0x60] sm:$0xff]  ;;  %v353_v22 = vld [vmem:[%s512_s3 + $0x18] sm:$0xff] }
   0xb   :  { %280 = vmatmul.msk.bf16.vlgmr.msra.gmra.mxu0 %vm54_vm0, %v23_v17  ;;  %v361_v23 = vld [vmem:[%s512_s3 + $0x58] sm:$0xff]  ;;  %v352_v24 = vld [vmem:[%s512_s3 + $0x10] sm:$0xff]  ;;  %v351_v26 = vld [vmem:[%s512_s3 + $0x8] sm:$0xff] }
   0xc   :  { %281 = vmatmul.msk.bf16.vlgmr.msra.gmra.mxu1 %vm54_vm0, %v23_v17  ;;  %v360_v25 = vld [vmem:[%s512_s3 + $0x50] sm:$0xff]  ;;  %v359_v27 = vld [vmem:[%s512_s3 + $0x48] sm:$0xff]  ;;  %v350_v28 = vld [vmem:[%s512_s3] sm:$0xff] }
   0xd   :  { %222 = vmatpush.bf16.msra.mxu2 %v355_v18  ;;  %v358_v29 = vld [vmem:[%s512_s3 + $0x40] sm:$0xff] }
   0xe   :  { %235 = vmatpush.bf16.msra.mxu3 %v363_v19  ;;  %v28_v30 = vld [vmem:[%s511_s2] sm:$0x3]  ;;  %s394_s2 = smov [#allocation2]  }
   0xf   :  { %v30_v31 = vperm.slane %v28_v30, 0  ;;  %v31_v32 = vperm.slane %v28_v30, 1  ;;  %v367_v43 = vld [vmem:[%s513_s4] ss:$0 sm:$0xff]  ;;  %s253_s0 = sshll.u32 %s394_s2, 4  ;;  %s254_s0 = int_to_ptr.vmem [resolvable:$true] %s253_s0 }
  0x11   :  { %223 = vmatpush.bf16.msra.mxu2 %v354_v20 }
  0x12   :  { %236 = vmatpush.bf16.msra.mxu3 %v362_v21 }
  0x15   :  { %224 = vmatpush.bf16.msra.mxu2 %v353_v22 }
  0x16   :  { %237 = vmatpush.bf16.msra.mxu3 %v361_v23 }
  0x19   :  { %225 = vmatpush.bf16.msra.mxu2 %v352_v24 }
  0x1a   :  { %238 = vmatpush.bf16.msra.mxu3 %v360_v25 }
  0x1d   :  { %226 = vmatpush.bf16.msra.mxu2 %v351_v26 }
  0x1e   :  { %239 = vmatpush.bf16.msra.mxu3 %v359_v27 }
  0x21   :  { %227 = vmatpush.bf16.msra.mxu2 %v350_v28 }
  0x22   :  { %240 = vmatpush.bf16.msra.mxu3 %v358_v29 }
  0x88   :  { %v67_v33 = vpop.f32.mrf.mxu0 }
  0x89   :  { %v68_v34 = vadd.f32 %v67_v33, %v30_v31  ;;  %v80_v35 = vpop.f32.mrf.mxu1 }
  0x8a   :  { %v81_v36 = vadd.f32 %v80_v35, %v31_v32 }
  0x8b   :  { %v84_v37 = vmax.f32 %v68_v34, 0.0 }
  0x8c   :  { %v85_v38 = vmax.f32 %v81_v36, 0.0 }
  0x8d   :  { %v86_v39 = vpack.c.bf16 %v84_v37, %v84_v37 }
  0x8e   :  { %v87_v40 = vpack.c.bf16 %v85_v38, %v85_v38 }
  0x8f   :  { %228 = vmatmul.bf16.vlgmr.msra.gmra.mxu2 %v86_v39 }
  0x90   :  { %241 = vmatmul.bf16.vlgmr.msra.gmra.mxu3 %v87_v40  ;;  %v69_v41 = vpop.f32.mrf.mxu0 }
  0x91   :  { %v82_v42 = vpop.f32.mrf.mxu1 }
 0x112   :  { %v229_v44 = vpop.f32.mrf.mxu2 }
 0x113   :  { %v230_v45 = vadd.f32 %v367_v43, %v229_v44  ;;  %v242_v46 = vpop.f32.mrf.mxu3 }
 0x115   :  { %v243_v47 = vadd.f32 %v242_v46, %v230_v45 }
 0x117   :  { %247 = vst.msk [vmem:[#allocation2] sm:$0xff] %vm246_vm1, %v243_v47 }
 0x118   :  { %258 = dma.vmem_to_hbm [thread:$0]  %s254_s0, 128, %s256_s20, [#allocation3]  }
 0x11a   :  { %v231_v48 = vpop.f32.mrf.mxu2 }
 0x11b   :  { %v244_v49 = vpop.f32.mrf.mxu3 }
 0x11c   :  { %392 = dma.done.wait [#allocation3], 128  }
 0x11d   :  { %393 = vsyncadd [#allocation3], 4294967168 }
 0x11e   :  { %263 = vsyncpa [#allocation3], 1 }

</bundles_post_ra>
